<compile_context>
chip_gen: v7x
topology: tpu7x:2x2x1
jax: 0.10.0
libtpu: 0.0.40
codegen_flags: <defaults>
</compile_context>

<pallas_src>
import functools

import jax
import jax.numpy as jnp
from jax.experimental import pallas as pl
from jax.experimental.pallas import tpu as pltpu


_MIN_BLOCKS = 4  # >=4 blocks -> DMA/compute overlap; even count -> v7x TC balance


# ------------------------------- kernel ------------------------------------


def _rmsnorm_kernel(x_ref, g_ref, o_ref, *, inv_scale, eps, low_precision_mul):
    # x_ref: (tile_rows, dim), g_ref: (1, dim), o_ref: (tile_rows, dim)
    x = x_ref[...]
    xf = x.astype(jnp.float32)

    # norm = sqrt(sum(x^2, -1)) * dim**-0.5 ; out = x / norm.clamp(min=eps) * g
    # Rewritten as a per-row rsqrt (EUP slot, (tile, 1) only) followed by two
    # broadcast multiplies, avoiding a full (tile_rows, dim) divide.
    sumsq = jnp.sum(xf * xf, axis=-1, keepdims=True)         # (tile, 1) f32
    inv = jax.lax.rsqrt(sumsq) * inv_scale                   # = 1/(sqrt(ss)*scale)
    inv = jnp.minimum(inv, 1.0 / eps)                        # == norm.clamp(min=eps)

    if low_precision_mul:
        # bf16 VALU path (v6e/v7x): only the (tile, 1) stats are f32; the two
        # full-tile multiplies run in the native dtype.
        o_ref[...] = (
            x * inv.astype(x.dtype) * g_ref[...].astype(x.dtype)
        ).astype(o_ref.dtype)
    else:
        o_ref[...] = (xf * inv * g_ref[...].astype(jnp.float32)).astype(o_ref.dtype)


# ------------------------------ wrapper -------------------------------------


def _round_down(x, m):
    return (x // m) * m


def _round_up(x, m):
    return ((x + m - 1) // m) * m


def _default_vmem_limit_bytes():
    # Generation-aware scoped-VMEM limit: ~75% of physical VMEM, capped at
    # 96 MiB.  v7x (64 MiB physical) -> 48 MiB; v5e/v6e (128 MiB) -> 96 MiB.
    try:
        cap = pltpu.get_tpu_info().vmem_capacity_bytes
    except Exception:
        cap = 64 * 1024 * 1024  # conservative (v7x-sized) fallback
    return min((cap * 3) // 4, 96 * 1024 * 1024)


def _has_native_bf16_vpu():
    # bf16 VALU exists on v6e/v7x; v5e and older expand bf16 math to f32
    # (net loss), so keep the f32 compute path there.
    try:
        kind = jax.devices()[0].device_kind.lower()
    except Exception:
        return False
    return not any(tag in kind for tag in ("v2", "v3", "v4", "v5"))


def _auto_tile_rows(dim, itemsize, sublane, vmem_limit_bytes, n_f32_temps):
    # VMEM footprint per row of tile: 2 input + 2 output double-buffers plus
    # the in-kernel f32 temporaries (upcast x, x*x, product).
    bytes_per_row = dim * (4 * itemsize + n_f32_temps * 4)
    budget = int(vmem_limit_bytes * 0.8)          # headroom for compiler scratch
    rows_budget = max(sublane, budget // bytes_per_row)
    # ~6 MiB per input buffer keeps the kernel near the HBM roofline while
    # amortizing the ~0.35 us per-grid-step overhead, even for small dims.
    rows_target = max(sublane, (6 * 1024 * 1024) // (dim * itemsize))
    return min(rows_budget, rows_target)


def rmsnorm(x, g, eps=1e-8, *, tile_rows=None, vmem_limit_bytes=None):
    """RMSNorm over the last axis of x. g has shape (dim,)."""
    orig_shape = x.shape
    dim = orig_shape[-1]

    rows = 1
    for s in orig_shape[:-1]:
        rows *= s

    # Reshapes only (views): no pad / slice round trips through HBM.
    x2d = x.reshape(rows, dim)
    g2d = g.reshape(1, dim)

    itemsize = x.dtype.itemsize
    sublane = max(8, 32 // itemsize)  # packing granularity: 8 f32 / 16 bf16 / 32 i8

    low_precision_mul = (x.dtype == jnp.bfloat16) and _has_native_bf16_vpu()
    n_f32_temps = 2 if low_precision_mul else 3

    if vmem_limit_bytes is None:
        vmem_limit_bytes = _default_vmem_limit_bytes()

    auto = tile_rows is None
    if auto:
        tile_rows = _auto_tile_rows(dim, itemsize, sublane, vmem_limit_bytes,
                                    n_f32_temps)
        if rows >= _MIN_BLOCKS * sublane:
            # At least _MIN_BLOCKS blocks (even count preferred) so the DMA
            # pipeline has something to overlap and both v7x TensorCores get
            # work on the "parallel" row axis (best-effort after rounding).
            nblocks = max(pl.cdiv(rows, tile_rows), _MIN_BLOCKS)
            if nblocks % 2:
                nblocks += 1
            tile_rows = _round_up(pl.cdiv(rows, nblocks), sublane)

    if tile_rows >= rows:
        tile_rows = rows  # single full-extent block (always a legal block shape)
    else:
        tile_rows = max(sublane, _round_down(tile_rows, sublane))
    grid = (pl.cdiv(rows, tile_rows),)

    kernel = functools.partial(
        _rmsnorm_kernel,
        inv_scale=float(dim) ** 0.5,
        eps=float(eps),
        low_precision_mul=low_precision_mul,
    )

    out2d = pl.pallas_call(
        kernel,
        out_shape=jax.ShapeDtypeStruct((rows, dim), x.dtype),
        grid_spec=pltpu.PrefetchScalarGridSpec(
            num_scalar_prefetch=0,
            grid=grid,
            in_specs=[
                pl.BlockSpec((tile_rows, dim), lambda i: (i, 0)),
                pl.BlockSpec((1, dim), lambda i: (0, 0)),
            ],
            out_specs=pl.BlockSpec((tile_rows, dim), lambda i: (i, 0)),
        ),
        compiler_params=pltpu.CompilerParams(
            dimension_semantics=("parallel",),
            vmem_limit_bytes=int(vmem_limit_bytes),
        ),
    )(x2d, g2d)

    return out2d.reshape(orig_shape)


def rmsnorm_reference(x, g, eps=1e-8):
    dim = x.shape[-1]
    scale = dim ** (-0.5)
    xf = x.astype(jnp.float32)
    norm = jnp.sqrt(jnp.sum(xf * xf, axis=-1, keepdims=True)) * scale
    norm = jnp.maximum(norm, eps)
    return (xf / norm * g.astype(jnp.float32)).astype(x.dtype)


if __name__ == "__main__":
    key = jax.random.PRNGKey(0)

    # Test 1: module-scale shape (batch=2, seq=8, hidden=32), single block.
    batch, seq, dim = 2, 8, 32
    x = jax.random.normal(key, (batch, seq, dim), dtype=jnp.float32)
    g = jnp.ones((dim,), dtype=jnp.float32)  # nn.Parameter(torch.ones(dim))
    out = jax.block_until_ready(rmsnorm(x, g))
    ref = rmsnorm_reference(x, g)
    assert out.shape == x.shape
    assert jnp.allclose(out, ref, atol=1e-5, rtol=1e-5), "mismatch (test 1)"

    # Test 2: lane-dense feature dim (multiple of 128); auto tiling now splits
    # the 256 rows into >= 4 blocks for pipelining / megacore.
    k2 = jax.random.PRNGKey(1)
    x2 = jax.random.normal(k2, (4, 64, 256), dtype=jnp.float32)
    g2 = jax.random.normal(jax.random.PRNGKey(2), (256,), dtype=jnp.float32)
    out2 = jax.block_until_ready(rmsnorm(x2, g2))
    ref2 = rmsnorm_reference(x2, g2)
    assert jnp.allclose(out2, ref2, atol=1e-5, rtol=1e-5), "mismatch (test 2)"

    # Test 3: multi-block grid with a partial boundary block (rows=100,
    # tile=32) exercising the no-pad cdiv path and masked boundary stores.
    k3 = jax.random.PRNGKey(3)
    x3 = jax.random.normal(k3, (1, 100, 256), dtype=jnp.float32)
    out3 = jax.block_until_ready(rmsnorm(x3, g2, tile_rows=32))
    ref3 = rmsnorm_reference(x3, g2)
    assert jnp.allclose(out3, ref3, atol=1e-5, rtol=1e-5), "mismatch (test 3)"

    # Test 4: bf16 input — exercises the native-dtype multiply path on
    # v6e/v7x (f32 fallback on v5e).  Loose tolerance for bf16 rounding.
    k4 = jax.random.PRNGKey(4)
    x4 = jax.random.normal(k4, (2, 64, 256), dtype=jnp.bfloat16)
    g4 = g2.astype(jnp.bfloat16)
    out4 = jax.block_until_ready(rmsnorm(x4, g4))
    ref4 = rmsnorm_reference(x4, g4)
    assert jnp.allclose(out4.astype(jnp.float32), ref4.astype(jnp.float32),
                        atol=6e-2, rtol=6e-2), "mismatch (test 4)"

    print("KERNEL_OK")
</pallas_src>

<mosaic_0001>
module attributes {stable_mosaic.version = 11 : i64} {
  func.func @_rmsnorm_kernel(%arg0: i32, %arg1: memref<16x32xf32, #tpu.memory_space<vmem>>, %arg2: memref<1x32xf32, #tpu.memory_space<vmem>>, %arg3: memref<16x32xf32, #tpu.memory_space<vmem>>) attributes {dimension_semantics = [#tpu.dimension_semantics<parallel>], iteration_bounds = array<i64: 1>, scalar_prefetch = 0 : i64, scratch_operands = 0 : i64, tpu.core_type = #tpu.core_type<tc>, window_params = [{transform_indices = @transform_0, window_bounds = array<i64: 16, 32>}, {pipeline_mode = #tpu.pipeline_mode<synchronous>, transform_indices = @transform_1, window_bounds = array<i64: 1, 32>}, {transform_indices = @transform_2, window_bounds = array<i64: 16, 32>}]} {
    %c0 = arith.constant 0 : index
    %c0_0 = arith.constant 0 : index
    %0 = vector.load %arg1[%c0, %c0_0] : memref<16x32xf32, #tpu.memory_space<vmem>>, vector<16x32xf32>
    %1 = arith.mulf %0, %0 : vector<16x32xf32>
    %cst = arith.constant dense<0.000000e+00> : vector<16xf32>
    %2 = vector.multi_reduction <add>, %1, %cst [1] : vector<16x32xf32> to vector<16xf32>
    %3 = vector.shape_cast %2 : vector<16xf32> to vector<16x1xf32>
    %4 = math.rsqrt %3 : vector<16x1xf32>
    %cst_1 = arith.constant 5.65685415 : f32
    %5 = vector.broadcast %cst_1 : f32 to vector<16x1xf32>
    %6 = arith.mulf %4, %5 : vector<16x1xf32>
    %cst_2 = arith.constant 1.000000e+08 : f32
    %7 = vector.broadcast %cst_2 : f32 to vector<16x1xf32>
    %8 = arith.minimumf %6, %7 : vector<16x1xf32>
    %9 = vector.broadcast %8 : vector<16x1xf32> to vector<16x32xf32>
    %10 = arith.mulf %0, %9 : vector<16x32xf32>
    %c0_3 = arith.constant 0 : index
    %c0_4 = arith.constant 0 : index
    %11 = vector.load %arg2[%c0_3, %c0_4] : memref<1x32xf32, #tpu.memory_space<vmem>>, vector<1x32xf32>
    %12 = vector.broadcast %11 : vector<1x32xf32> to vector<16x32xf32>
    %13 = arith.mulf %10, %12 : vector<16x32xf32>
    %c0_5 = arith.constant 0 : index
    %c0_6 = arith.constant 0 : index
    %14 = vector.load %arg3[%c0_5, %c0_6] : memref<16x32xf32, #tpu.memory_space<vmem>>, vector<16x32xf32>
    tpu.vector_store %arg3[%c0_5, %c0_6], %13 {strides = array<i32>} : memref<16x32xf32, #tpu.memory_space<vmem>>, vector<16x32xf32>,
    return
  }
  func.func @transform_0(%arg0: i32) -> (i32, i32) {
    %c0_i32 = arith.constant 0 : i32
    %c0_i32_0 = arith.constant 0 : i32
    return %arg0, %c0_i32 : i32, i32
  }
  func.func @transform_1(%arg0: i32) -> (i32, i32) {
    %c0_i32 = arith.constant 0 : i32
    %c0_i32_0 = arith.constant 0 : i32
    %c0_i32_1 = arith.constant 0 : i32
    return %c0_i32, %c0_i32_0 : i32, i32
  }
  func.func @transform_2(%arg0: i32) -> (i32, i32) {
    %c0_i32 = arith.constant 0 : i32
    %c0_i32_0 = arith.constant 0 : i32
    return %arg0, %c0_i32 : i32, i32
  }
}

</mosaic_0001>

<bundles_post_ra>
// kernel: tpu_custom_call.1
= control target key start
LH: loop header
LB: loop body
LE: loop exit
PB: predicated region body
PF: predicated region fallthrough
CT: control target
= control target key end

     0   :  { %7 = vsyncpa [#allocation3], 0  ;;  %s186_s0 = inlined_call_operand.hbm [shape: f32[16,32], index: 0, kind: input, shape index: {}]   ;;  %s187_s1 = inlined_call_operand.vmem [shape: f32[1,32], index: 1, kind: input, shape index: {}]   ;;  %s188_s2 = inlined_call_operand.hbm [shape: f32[16,32], index: 2, kind: output, shape index: {}]  }
   0x1   :  { %8 = vsyncpa [#allocation4], 0  ;;  %s130_s9 = smov [#allocation2]   ;;  %s82_s13 = scalar_lea.hbm %s186_s0, 256 }
   0x2   :  { %s14_s10 = sshll.u32 %s130_s9, 4  ;;  %p83_p0 = scmp.ne.s32.totalorder %s186_s0, %s82_s13  ;;  %s15_s10 = int_to_ptr.vmem [resolvable:$true] %s14_s10 }
   0x3   :  { %p86_p1 = scmp.lt.u32.totalorder %s82_s13, %s186_s0 }
   0x5   :  { %p88_p2 = pnand %p86_p1, %p83_p0 }
   0x7   :  { %91 = shalt.err (!%p88_p2)
}
   0x8   :  { %s92_s18 = scalar_lea.vmem %s15_s10, 256  ;;  %p97_p4 = scmp.lt.s32.totalorder %s15_s10, %s15_s10 }
   0x9   :  { %p93_p3 = scmp.ne.s32.totalorder %s15_s10, %s92_s18  ;;  %p98_p5 = scmp.lt.s32.totalorder %s92_s18, %s92_s18 }
   0xb   :  { %p99_p6 = por %p98_p5, %p97_p4 }
   0xd   :  { %p100_p7 = pnand %p99_p6, %p93_p3 }
   0xf   :  { %103 = shalt.err (!%p100_p7)
}
  0x10   :  { %s131_s19 = smov 128   ;;  %s132_s20 = smov 8  }
  0x11   :  { %20 = dma.hbm_to_vmem [thread:$0]  %s186_s0, 256, %s15_s10, [#allocation3], %s131_s19, %s131_s19, %s132_s20  }
  0x12   :  { %126 = dma.done.wait [#allocation3], 256  }
  0x13   :  { %127 = vsyncadd [#allocation3], 4294967040  ;;  %v26_v0 = vld [vmem:[#allocation2] sm:$0xff]  ;;  %vm30_vm0 = vcmask 261120   ;;  %v27_v1 = vld [vmem:[#allocation2 + $0x8] sm:$0xff]  ;;  %s133_s24 = smov [#allocation5]  }
  0x14   :  { %v28_v2 = vmul.f32 %v26_v0, %v26_v0  ;;  %v29_v3 = vmul.f32 %v27_v1, %v27_v1  ;;  %v73_v12 = vld [vmem:[%s187_s1] ss:$0 sm:$0xff]  ;;  %s61_s25 = sshll.u32 %s133_s24, 4  ;;  %s62_s25 = int_to_ptr.vmem [resolvable:$true] %s61_s25 }
  0x15   :  { %s104_s26 = scalar_lea.vmem %s62_s25, 256  ;;  %p109_p9 = scmp.lt.s32.totalorder %s62_s25, %s62_s25 }
  0x16   :  { %v31_v4 = vsel %vm30_vm0, %v28_v2, 0.0  ;;  %v34_v5 = vsel %vm30_vm0, %v29_v3, 0.0  ;;  %p105_p8 = scmp.ne.s32.totalorder %s62_s25, %s104_s26  ;;  %p110_p10 = scmp.lt.s32.totalorder %s104_s26, %s104_s26 }
  0x17   :  { %32 = vadd.xlane.f32.xlu0 %v31_v4 }
  0x18   :  { %p111_p11 = por %p110_p10, %p109_p9 }
  0x1a   :  { %p112_p12 = pnand %p111_p11, %p105_p8 }
  0x1b   :  { %35 = vadd.xlane.f32.xlu0 %v34_v5 }
  0xa4   :  { %v33_v6 = vpop.xlane.xlu0 %32 }
  0xa5   :  { %78 = vrsqrt.f32 %v33_v6 }
  0xa8   :  { %v36_v7 = vpop.xlane.xlu0 %35 }
  0xa9   :  { %80 = vrsqrt.f32 %v36_v7 }
  0xaf   :  { %v79_v8 = vpop.eup %78 }
  0xb0   :  { %v39_v9 = vmul.f32 5.656854, %v79_v8 }
  0xb2   :  { %v41_v10 = vmin.f32 %v39_v9, 1e+08 }
  0xb3   :  { %v81_v11 = vpop.eup %80 }
  0xb4   :  { %v43_v13 = vmul.f32 %v41_v10, %v26_v0  ;;  %v40_v14 = vmul.f32 5.656854, %v81_v11 }
  0xb6   :  { %v52_v15 = vmul.f32 %v73_v12, %v43_v13  ;;  %v42_v16 = vmin.f32 %v40_v14, 1e+08 }
  0xb8   :  { %54 = vst.msk [vmem:[#allocation5] sm:$0xff] %vm30_vm0, %v52_v15  ;;  %v44_v17 = vmul.f32 %v42_v16, %v27_v1 }
  0xba   :  { %v53_v18 = vmul.f32 %v73_v12, %v44_v17 }
  0xbc   :  { %55 = vst.msk [vmem:[#allocation5 + $0x8] sm:$0xff] %vm30_vm0, %v53_v18 }
  0xbd   :  { %115 = shalt.err (!%p112_p12)
}
  0xbe   :  { %s116_s28 = scalar_lea.hbm %s188_s2, 256 }
  0xbf   :  { %p117_p13 = scmp.ne.s32.totalorder %s188_s2, %s116_s28  ;;  %p120_p0 = scmp.lt.u32.totalorder %s116_s28, %s188_s2 }
  0xc1   :  { %p122_p1 = pnand %p120_p0, %p117_p13 }
  0xc3   :  { %125 = shalt.err (!%p122_p1)
}
  0xc4   :  { %67 = dma.vmem_to_hbm [thread:$0]  %s62_s25, 256, %s188_s2, [#allocation4], %s131_s19, %s131_s19, %s132_s20  }
  0xc5   :  { %128 = dma.done.wait [#allocation4], 256  }
  0xc6   :  { %129 = vsyncadd [#allocation4], 4294967040 }
  0xc7   :  { %71 = vsyncpa [#allocation3], 1 }
  0xc8   :  { %72 = vsyncpa [#allocation4], 1 }

</bundles_post_ra>
